<compile_context>
chip_gen: v5e
topology: v5e:2x2
jax: 0.10.0
libtpu: 0.0.40
codegen_flags: <defaults>
</compile_context>

<pallas_src>
import functools

import jax
import jax.numpy as jnp
from jax.experimental import pallas as pl
from jax.experimental.pallas import tpu as pltpu

LRELU_SLOPE = 0.1

_VMEM_LIMIT_BYTES = 48 * 1024 * 1024


def get_padding(kernel_size, dilation=1):
    return (kernel_size * dilation - dilation) // 2


# ----------------------------------------------------------------------------
# Pallas kernel: one sample's Conv2d(K,1) + bias (+ leaky-relu)
#   x_ref: (G, stride*Cin) bf16  -- stride-grouped, zero-padded activation
#   w_ref: (K*Cin, Cout)   bf16  -- resident across the grid
#   b_ref: (1, Cout)       f32   -- resident across the grid
#   o_ref: (Hout, Cout)    bf16
# out[h] = sum_j dot(xg[h+j, 0:c_j], W[j*stride*Cin : j*stride*Cin + c_j]) + bias
# ----------------------------------------------------------------------------
def _conv_kernel(x_ref, w_ref, b_ref, o_ref, *, stride, K, Cin, Hout, n_dots,
                 apply_lrelu):
    SC = stride * Cin
    acc = None
    for j in range(n_dots):
        c = min(stride, K - j * stride) * Cin          # contraction width of dot j
        xs = x_ref[j:j + Hout, 0:c]                    # static slices
        ws = w_ref[j * SC:j * SC + c, :]
        d = jnp.dot(xs, ws, preferred_element_type=jnp.float32)
        acc = d if acc is None else acc + d
    acc = acc + b_ref[...]
    if apply_lrelu:
        acc = jnp.maximum(acc, LRELU_SLOPE * acc)      # one vmul + vmax
    o_ref[...] = acc.astype(o_ref.dtype)


def conv_h(x, w, b, *, stride, pad, apply_lrelu, out_pad_to=None):
    """Conv2d with kernel (K, 1): convolution along H only, channels-last layout.

    x: (N, H, Cin) with N = batch*period;  w: (K, Cin, Cout);  b: (Cout,)
    returns (N, Hout, Cout) bfloat16
    """
    N, H, Cin = x.shape
    K, _, Cout = w.shape
    Hout = (H + 2 * pad - K) // stride + 1
    n_dots = -(-K // stride)                 # ceil(K / stride)
    G = Hout + n_dots - 1                    # groups needed (incl. halo group)
    Hp = stride * G                          # padded rows (>= conv-padded extent used)
    SC = stride * Cin
    KC = K * Cin

    # XLA glue: zero-pad along H (conv padding + group alignment) and regroup rows.
    # The reshape is a row-major reinterpretation (no extra copy beyond the pad).
    xp = jnp.pad(x.astype(jnp.bfloat16), ((0, 0), (pad, Hp - pad - H), (0, 0)))
    xg = xp.reshape(N, G, SC)

    # Weights (K, Cin, Cout) -> (K*Cin, Cout); row order matches the group layout.
    w2 = w.reshape(KC, Cout)
    b2 = b
    cout_k = Cout
    if out_pad_to is not None and Cout < out_pad_to:
        # Lane-dense output stores: pad channels with zero weights/bias, slice after.
        w2 = jnp.pad(w2, ((0, 0), (0, out_pad_to - Cout)))
        b2 = jnp.pad(b2, (0, out_pad_to - Cout))
        cout_k = out_pad_to
    w2 = w2.astype(jnp.bfloat16)
    b2 = b2.reshape(1, cout_k).astype(jnp.float32)

    kern = functools.partial(
        _conv_kernel, stride=stride, K=K, Cin=Cin, Hout=Hout, n_dots=n_dots,
        apply_lrelu=apply_lrelu)

    out = pl.pallas_call(
        kern,
        out_shape=jax.ShapeDtypeStruct((N, Hout, cout_k), jnp.bfloat16),
        grid=(N,),                                        # one step per (batch, period)
        in_specs=[
            pl.BlockSpec((None, G, SC), lambda i: (i, 0, 0)),      # streamed activation
            pl.BlockSpec((KC, cout_k), lambda i: (0, 0)),          # resident weights
            pl.BlockSpec((1, cout_k), lambda i: (0, 0)),           # resident bias
        ],
        out_specs=pl.BlockSpec((None, Hout, cout_k), lambda i: (i, 0, 0)),
        compiler_params=pltpu.CompilerParams(
            dimension_semantics=("parallel",),            # 2-TC sharding on v7x
            vmem_limit_bytes=_VMEM_LIMIT_BYTES,
        ),
    )(xg, w2, b2)

    if cout_k != Cout:
        out = out[..., :Cout]
    return out


# ----------------------------------------------------------------------------
# Parameters (deterministic synthetic init; weight_norm at init == raw weight)
# ----------------------------------------------------------------------------
def init_params(key, d_mult=0.25, kernel_size=5):
    chans = [1,
             int(32 * d_mult),
             int(128 * d_mult),
             int(512 * d_mult),
             int(1024 * d_mult),
             int(1024 * d_mult)]
    params = {"convs": [], "post": None}
    keys = jax.random.split(key, len(chans))
    for i in range(5):
        cin, cout = chans[i], chans[i + 1]
        kw, kb = jax.random.split(keys[i])
        scale = 1.0 / jnp.sqrt(cin * kernel_size)
        w = jax.random.normal(kw, (kernel_size, cin, cout), jnp.float32) * scale
        b = jax.random.normal(kb, (cout,), jnp.float32) * 0.01
        pad = get_padding(5, 1) if i < 4 else 2   # both are 2, mirrors the module
        params["convs"].append((w, b, 3, pad))    # stride 3 for all 5 convs (per spec)
    # conv_post: Conv2d(1024*d_mult, 1, (3,1), stride 1, padding=(1,0))
    cin = chans[-1]
    kw, kb = jax.random.split(keys[-1])
    scale = 1.0 / jnp.sqrt(cin * 3)
    w = jax.random.normal(kw, (3, cin, 1), jnp.float32) * scale
    b = jax.random.normal(kb, (1,), jnp.float32) * 0.01
    params["post"] = (w, b, 1, 1)
    return params


# ----------------------------------------------------------------------------
# Forward pass (mirrors DiscriminatorP.forward)
# ----------------------------------------------------------------------------
def _to_nchw(h, batch, period, dtype=jnp.float32):
    # (batch*period, Hout, C) -> (batch, C, Hout, period)   (torch NCHW fmap layout)
    N, Hout, C = h.shape
    return jnp.transpose(h.reshape(batch, period, Hout, C), (0, 3, 2, 1)).astype(dtype)


def discriminator_p_forward(x, params, period):
    # x: (b, 1, t) -- same as the torch module input
    b, c, t = x.shape
    if t % period != 0:
        n_pad = period - t % period
        x = jnp.pad(x, ((0, 0), (0, 0), (0, n_pad)), mode="reflect")
        t = t + n_pad
    H = t // period
    x_nchw = x.reshape(b, c, H, period)                       # (b, 1, H, period)
    # kernel layout: (b*period, H, C) channels-last; each (b, p) column is independent
    h = jnp.transpose(x_nchw, (0, 3, 2, 1)).reshape(b * period, H, c)

    fmap = []
    for (w, bb, stride, pad) in params["convs"]:
        h = conv_h(h, w, bb, stride=stride, pad=pad, apply_lrelu=True)
        fmap.append(_to_nchw(h, b, period))
    w, bb, stride, pad = params["post"]
    # conv_post: Cout=1 -> pad output lanes to 128 inside the call, slice outside.
    h = conv_h(h, w, bb, stride=stride, pad=pad, apply_lrelu=False, out_pad_to=128)
    last = _to_nchw(h, b, period)
    fmap.append(last)

    x_flat = last.reshape(b, -1)   # torch.flatten(x, 1, -1) with C=1
    return x_flat, fmap


if __name__ == "__main__":
    key = jax.random.PRNGKey(0)
    kp, kx = jax.random.split(key)

    period = 3
    d_mult = 0.25              # cfg.model.mpd.discriminator_channel_multi
    params = init_params(kp, d_mult=d_mult, kernel_size=5)

    # small input consistent with forward(): (batch, 1, seq)
    b, c, t = 2, 1, 250
    x = jax.random.normal(kx, (b, c, t), jnp.float32)

    out, fmap = discriminator_p_forward(x, params, period)
    jax.block_until_ready(out)
    for f in fmap:
        jax.block_until_ready(f)

    assert out.ndim == 2 and out.shape[0] == b
    assert len(fmap) == 6
    print("KERNEL_OK")
</pallas_src>

<mosaic_0001>
module attributes {stable_mosaic.version = 11 : i64} {
  func.func @_conv_kernel(%arg0: i32, %arg1: memref<1x29x3xbf16, #tpu.memory_space<vmem>>, %arg2: memref<5x8xbf16, #tpu.memory_space<vmem>>, %arg3: memref<1x8xf32, #tpu.memory_space<vmem>>, %arg4: memref<1x28x8xbf16, #tpu.memory_space<vmem>>) attributes {dimension_semantics = [#tpu.dimension_semantics<parallel>], iteration_bounds = array<i64: 6>, scalar_prefetch = 0 : i64, scratch_operands = 0 : i64, tpu.core_type = #tpu.core_type<tc>, window_params = [{transform_indices = @transform_0, window_bounds = array<i64: 1, 29, 3>}, {pipeline_mode = #tpu.pipeline_mode<synchronous>, transform_indices = @transform_1, window_bounds = array<i64: 5, 8>}, {pipeline_mode = #tpu.pipeline_mode<synchronous>, transform_indices = @transform_2, window_bounds = array<i64: 1, 8>}, {transform_indices = @transform_3, window_bounds = array<i64: 1, 28, 8>}]} {
    %c0 = arith.constant 0 : index
    %c0_0 = arith.constant 0 : index
    %c0_1 = arith.constant 0 : index
    %0 = vector.load %arg1[%c0, %c0_0, %c0_1] : memref<1x29x3xbf16, #tpu.memory_space<vmem>>, vector<1x28x3xbf16>
    %1 = vector.shape_cast %0 : vector<1x28x3xbf16> to vector<28x3xbf16>
    %c0_2 = arith.constant 0 : index
    %c0_3 = arith.constant 0 : index
    %2 = vector.load %arg2[%c0_2, %c0_3] : memref<5x8xbf16, #tpu.memory_space<vmem>>, vector<3x8xbf16>
    %cst = arith.constant dense<0.000000e+00> : vector<28x8xf32>
    %3 = tpu.matmul %1, %2, %cst {dimension_numbers = #tpu.dot_dimension_numbers<[1], [0], [0], [1], [0, 0, 1, 1], [], []>} : vector<28x3xbf16>, vector<3x8xbf16>, vector<28x8xf32> -> vector<28x8xf32>
    %c0_4 = arith.constant 0 : index
    %c1 = arith.constant 1 : index
    %c0_5 = arith.constant 0 : index
    %4 = vector.load %arg1[%c0_4, %c1, %c0_5] : memref<1x29x3xbf16, #tpu.memory_space<vmem>>, vector<1x28x2xbf16>
    %5 = vector.shape_cast %4 : vector<1x28x2xbf16> to vector<28x2xbf16>
    %c3 = arith.constant 3 : index
    %c0_6 = arith.constant 0 : index
    %6 = vector.load %arg2[%c3, %c0_6] : memref<5x8xbf16, #tpu.memory_space<vmem>>, vector<2x8xbf16>
    %cst_7 = arith.constant dense<0.000000e+00> : vector<28x8xf32>
    %7 = tpu.matmul %5, %6, %cst_7 {dimension_numbers = #tpu.dot_dimension_numbers<[1], [0], [0], [1], [0, 0, 1, 1], [], []>} : vector<28x2xbf16>, vector<2x8xbf16>, vector<28x8xf32> -> vector<28x8xf32>
    %8 = arith.addf %3, %7 : vector<28x8xf32>
    %c0_8 = arith.constant 0 : index
    %c0_9 = arith.constant 0 : index
    %9 = vector.load %arg3[%c0_8, %c0_9] : memref<1x8xf32, #tpu.memory_space<vmem>>, vector<1x8xf32>
    %10 = vector.broadcast %9 : vector<1x8xf32> to vector<28x8xf32>
    %11 = arith.addf %8, %10 : vector<28x8xf32>
    %cst_10 = arith.constant 1.000000e-01 : f32
    %12 = vector.broadcast %cst_10 : f32 to vector<28x8xf32>
    %13 = arith.mulf %12, %11 : vector<28x8xf32>
    %14 = arith.maximumf %11, %13 : vector<28x8xf32>
    %15 = arith.truncf %14 : vector<28x8xf32> to vector<28x8xbf16>
    %c0_11 = arith.constant 0 : index
    %c0_12 = arith.constant 0 : index
    %c0_13 = arith.constant 0 : index
    %16 = vector.load %arg4[%c0_11, %c0_12, %c0_13] : memref<1x28x8xbf16, #tpu.memory_space<vmem>>, vector<1x28x8xbf16>
    %17 = vector.shape_cast %16 : vector<1x28x8xbf16> to vector<28x8xbf16>
    %18 = vector.shape_cast %15 : vector<28x8xbf16> to vector<1x28x8xbf16>
    tpu.vector_store %arg4[%c0_11, %c0_12, %c0_13], %18 {strides = array<i32>} : memref<1x28x8xbf16, #tpu.memory_space<vmem>>, vector<1x28x8xbf16>,
    return
  }
  func.func @transform_0(%arg0: i32) -> (i32, i32, i32) {
    %c0_i32 = arith.constant 0 : i32
    %c0_i32_0 = arith.constant 0 : i32
    %c0_i32_1 = arith.constant 0 : i32
    return %arg0, %c0_i32, %c0_i32_0 : i32, i32, i32
  }
  func.func @transform_1(%arg0: i32) -> (i32, i32) {
    %c0_i32 = arith.constant 0 : i32
    %c0_i32_0 = arith.constant 0 : i32
    %c0_i32_1 = arith.constant 0 : i32
    return %c0_i32, %c0_i32_0 : i32, i32
  }
  func.func @transform_2(%arg0: i32) -> (i32, i32) {
    %c0_i32 = arith.constant 0 : i32
    %c0_i32_0 = arith.constant 0 : i32
    %c0_i32_1 = arith.constant 0 : i32
    return %c0_i32, %c0_i32_0 : i32, i32
  }
  func.func @transform_3(%arg0: i32) -> (i32, i32, i32) {
    %c0_i32 = arith.constant 0 : i32
    %c0_i32_0 = arith.constant 0 : i32
    %c0_i32_1 = arith.constant 0 : i32
    return %arg0, %c0_i32, %c0_i32_0 : i32, i32, i32
  }
}

</mosaic_0001>

<bundles_post_ra>
// kernel: tpu_custom_call.1
= control target key start
LH: loop header
LB: loop body
LE: loop exit
PB: predicated region body
PF: predicated region fallthrough
CT: control target
= control target key end

     0   :  { %s424_s12 = smov 0   ;;  %s462_s0 = inlined_call_operand.vmem [shape: bf16[6,29,3], index: 0, kind: input, shape index: {}]   ;;  %s463_s1 = inlined_call_operand.vmem [shape: bf16[5,8], index: 1, kind: input, shape index: {}]   ;;  %s464_s2 = inlined_call_operand.vmem [shape: f32[1,8], index: 2, kind: input, shape index: {}]   ;;  %s465_s3 = inlined_call_operand.vmem [shape: bf16[6,28,8], index: 3, kind: output, shape index: {}]  }
   0x1 LB: > { %s361_s13 = sadd.s32 4294967295, %s401_s12   ;;  %p365_p0 = scmp.ge.s32.totalorder %s401_s12, 1  ;;  %s401_s12 = sphi %s424_s12, %s13_s12  }
   0x2   : > { %p137_p1 = scmp.lt.s32.totalorder %s401_s12, 7 }
   0x4   : > { %p138_p2 = pnand %p365_p0, %p137_p1 }
   0x5   : > { %p161_p3 = scmp.lt.s32.totalorder (!%p138_p2), %s361_s13, 5 }
   0x6   : > { %141 = sbr.rel (%p138_p2) target bundleno = 178 (0xb2), region = 32 }
   0xb   : > { %v176_v0 = vld [vmem:[%s463_s1] sm:$0x3]  ;;  %vm223_vm0 = vcmask 1040384   ;;  %vm255_vm1 = vcmask 1041408   ;;  %v403_v1 = vmov 65535   ;;  %s467_s13 = smov (!%p161_p3, %s361_s13), 5 }
   0xc   : > { %v256_v2 = vsel %vm223_vm0, 4294967295, %v403_v1  ;;  %v178_v3 = vld [vmem:[%s463_s1] sm:$0x6]  ;;  %s380_s18 = sshll.u32 %s467_s13, 4  ;;  %vm249_vm2 = vcmask 23552   ;;  %vm216_vm4 = vcmask 15360  }
   0xd   : > { %v257_v4 = vsel %vm255_vm1, %v256_v2, 0  ;;  %v206_v5 = vunpack.c.l.b16 %v178_v3  ;;  %s165_s21 = scalar_lea.vmem %s462_s0, %s380_s18  ;;  %vm189_vm3 = vsmask.f32 7424  ;;  %v394_v33 = vld [vmem:[%s464_s2] ss:$0 sm:$0xff]  ;;  %s170_s26 = scalar_lea.vmem %s465_s3, %s380_s18  ;;  %vm300_vm5 = vcmask 60416  }
   0xe   : > { %v259_v6 = vand.u32 %v257_v4, %v176_v0  ;;  %v174_v8 = vld [vmem:[%s165_s21 + $0x8] sm:$0xf]  ;;  %v175_v9 = vld [vmem:[%s165_s21 + $0xc] sm:$0x3]  ;;  %v382_v15 = vld [vmem:[%s165_s21] sm:$0xff]  ;;  %vm304_vm6 = vcmask 58368  }
   0xf   : > { %v207_v7 = vpack.c.b16 %v206_v5, %v206_v5  ;;  %v177_v10 = vld [vmem:[%s165_s21 + $0xc] sm:$0x7]  ;;  %v185_v11 = vunpack.c.l.b16 %v174_v8  ;;  %v247_v13 = vunpack.c.l.b16 %v175_v9  ;;  %v193_v20 = vshll.u32 %v382_v15, 16 }
  0x10   : > { %384 = vmatpush.bf16.msra.mxu3 %v259_v6  ;;  %268 = vmatpush.bf16.msra.mxu1 %v259_v6  ;;  %v186_v12 = vunpack.c.l.b16 %v177_v10  ;;  %v191_v22 = vshrl.u32 %v382_v15, 16 }
  0x11   : > { %v209_v14 = vshrl.u32 %v207_v7, 16  ;;  %v212_v16 = vshll.u32 %v207_v7, 16  ;;  %v248_v18 = vpack.c.b16 %v247_v13, %v185_v11  ;;  %v195_v23 = vrot.slane %v193_v20, 1 }
  0x12   : > { %v188_v17 = vpack.c.b16 %v186_v12, %v185_v11 }
  0x13   : > { %v211_v19 = vrot.slane %v209_v14, 1  ;;  %376 = vmatmul.msk.bf16.vlgmr.msra.gmra.mxu1 %vm249_vm2, %v382_v15  ;;  %v214_v21 = vrot.slane %v212_v16, 2  ;;  %377 = vmatmul.msk.bf16.vlgmr.msra.gmra.mxu3 %vm249_vm2, %v248_v18  ;;  %v196_v27 = vor.u32 %v195_v23, %v191_v22 }
  0x14   : > { %v198_v24 = vshll.u32 %v188_v17, 16  ;;  %v202_v25 = vshrl.u32 %v188_v17, 16 }
  0x15   : > { %v215_v26 = vor.u32 %v214_v21, %v211_v19 }
  0x16   : > { %v200_v28 = vrot.slane %v198_v24, 1 }
  0x17   : > { %v225_v29 = vsel %vm223_vm0, %v215_v26, 0 }
  0x18   : > { %234 = vmatpush.bf16.msra.mxu0 %v225_v29  ;;  %383 = vmatpush.bf16.msra.mxu2 %v225_v29  ;;  %v201_v30 = vsel %vm189_vm3, %v196_v27, %v200_v28  ;;  %v204_v31 = vor.u32 %v202_v25, %v200_v28 }
  0x1b   : > { %374 = vmatmul.msk.bf16.vlgmr.msra.gmra.mxu0 %vm216_vm4, %v201_v30  ;;  %375 = vmatmul.msk.bf16.vlgmr.msra.gmra.mxu2 %vm216_vm4, %v204_v31 }
  0x90   : > { %v270_v32 = vpop.f32.mrf.mxu1 }
  0x96   : > { %v275_v37 = vpop.f32.mrf.mxu3 }
  0x98   : > { %v236_v34 = vpop.f32.mrf.mxu0  ;;  %v272_v40 = vpop.f32.mrf.mxu1 }
  0x99   : > { %v271_v35 = vadd.f32 %v270_v32, %v236_v34 }
  0x9b   : > { %v284_v36 = vadd.f32 %v394_v33, %v271_v35 }
  0x9d   : > { %v288_v38 = vmul.f32 0.1, %v284_v36 }
  0x9e   : > { %v241_v39 = vpop.f32.mrf.mxu2  ;;  %v277_v51 = vpop.f32.mrf.mxu3 }
  0x9f   : > { %v292_v41 = vmax.f32 %v284_v36, %v288_v38  ;;  %v276_v42 = vadd.f32 %v275_v37, %v241_v39 }
  0xa0   : > { %v238_v43 = vpop.f32.mrf.mxu0 }
  0xa1   : > { %v296_v44 = vpack.c.bf16 %v292_v41, %v292_v41  ;;  %v286_v45 = vadd.f32 %v394_v33, %v276_v42  ;;  %v273_v46 = vadd.f32 %v272_v40, %v238_v43 }
  0xa3   : > { %301 = vst.msk [vmem:[%s170_s26] sm:$0xf] %vm300_vm5, %v296_v44  ;;  %v290_v47 = vmul.f32 0.1, %v286_v45  ;;  %v285_v48 = vadd.f32 %v394_v33, %v273_v46 }
  0xa5   : > { %v294_v49 = vmax.f32 %v286_v45, %v290_v47  ;;  %v289_v50 = vmul.f32 0.1, %v285_v48 }
  0xa6   : > { %v243_v52 = vpop.f32.mrf.mxu2 }
  0xa7   : > { %v298_v53 = vpack.c.bf16 %v294_v49, %v294_v49  ;;  %v293_v54 = vmax.f32 %v285_v48, %v289_v50  ;;  %v278_v55 = vadd.f32 %v277_v51, %v243_v52 }
  0xa9   : > { %303 = vst.msk [vmem:[%s170_s26 + $0x8] sm:$0xf] %vm300_vm5, %v298_v53  ;;  %v297_v56 = vpack.c.bf16 %v293_v54, %v293_v54  ;;  %v287_v57 = vadd.f32 %v394_v33, %v278_v55 }
  0xab   : > { %302 = vst.msk [vmem:[%s170_s26 + $0x4] sm:$0xf] %vm300_vm5, %v297_v56  ;;  %v291_v58 = vmul.f32 0.1, %v287_v57 }
  0xad   : > { %v295_v59 = vmax.f32 %v287_v57, %v291_v58 }
  0xaf   : > { %v299_v60 = vpack.c.bf16 %v295_v59, %v295_v59 }
  0xb1   : > { %305 = vst.msk [vmem:[%s170_s26 + $0xc] sm:$0x3] %vm304_vm6, %v299_v60 }
  0xb2 PF: > { %s13_s12 = sadd.s32 1, %s401_s12  }
  0xb3   : > { %p10_p4 = scmp.ge.s32.totalorder %s13_s12, 8  }
  0xb5   :  { %12 = sbr.rel (!%p10_p4) target bundleno = 1 (0x1), region = 62 }

</bundles_post_ra>
